<compile_context>
chip_gen: v6e
topology: v6e:2x2x1
jax: 0.10.0
libtpu: 0.0.40
codegen_flags: <defaults>
</compile_context>

<pallas_src>
import functools

import jax
import jax.numpy as jnp
from jax.experimental import pallas as pl
from jax.experimental.pallas import tpu as pltpu


def _round_up(n, m):
    return ((n + m - 1) // m) * m


def _pwff_kernel(x_ref, w1_ref, b1_ref, w2_ref, p2_ref, o_ref, acc_ref,
                 *, eps: float):
    """One (token-tile, d_ff-tile) grid step.

    x_ref : (tm, d_model)    token tile (same block across the d_ff axis)
    w1_ref: (d_model, tff)   fc1 weight tile
    b1_ref: (1, tff)         fc1 bias tile
    w2_ref: (tff, d_model)   fc2 weight tile
    p2_ref: (3, d_model)     packed [b2; gamma; beta]
    o_ref : (tm, d_model)    output tile (written on the last d_ff step)
    acc_ref: (tm, d_model)   f32 accumulator scratch
    """
    k = pl.program_id(1)
    nk = pl.num_programs(1)

    @pl.when(k == 0)
    def _():
        acc_ref[...] = jnp.zeros_like(acc_ref)

    x = x_ref[...]

    # fc1 tile + ReLU (MXU, f32 accumulate; operands stay in their own dtype).
    h = jnp.dot(x, w1_ref[...], preferred_element_type=jnp.float32)
    h = jnp.maximum(h + b1_ref[...].astype(jnp.float32), 0.0)
    # TODO(synk): training-mode dropout (p=0.1) would need prng_seed /
    # prng_random_bits masking here; eval/inference semantics implemented.

    # fc2 tile -> partial sum into the f32 accumulator.
    acc_ref[...] += jnp.dot(h.astype(w2_ref.dtype), w2_ref[...],
                            preferred_element_type=jnp.float32)

    # Epilogue on the last d_ff block: bias2 + residual + LayerNorm (all f32).
    @pl.when(k == nk - 1)
    def _():
        b2 = p2_ref[0:1, :].astype(jnp.float32)
        gamma = p2_ref[1:2, :].astype(jnp.float32)
        beta = p2_ref[2:3, :].astype(jnp.float32)

        r = x.astype(jnp.float32) + acc_ref[...] + b2
        mu = jnp.mean(r, axis=-1, keepdims=True)
        ms = jnp.mean(r * r, axis=-1, keepdims=True)
        var = ms - mu * mu                       # single-pass biased variance
        inv = jax.lax.rsqrt(var + eps)           # EUP slot
        o_ref[...] = ((r - mu) * inv * gamma + beta).astype(o_ref.dtype)


def position_wise_ffn(x, w1, b1, w2, b2, gamma, beta, *,
                      eps=1e-5, tm=256, tff=512):
    """x: (batch, seq, d_model).  Returns array of same shape/dtype.

    w1: (d_model, d_ff), b1: (d_ff,), w2: (d_ff, d_model),
    b2/gamma/beta: (d_model,).
    """
    B, S, d_model = x.shape
    d_ff = w1.shape[1]
    N = B * S

    # Token tile: large enough to feed the MXU, but don't over-pad tiny inputs.
    tm = max(8, min(tm, _round_up(N, 8)))
    n_pad = _round_up(N, tm)

    # d_ff tile: must divide d_ff and be lane-aligned; else keep d_ff resident.
    if d_ff % tff != 0 or tff % 128 != 0:
        tff = d_ff
    nk = d_ff // tff

    x2 = x.reshape(N, d_model)
    if n_pad != N:
        x2 = jnp.pad(x2, ((0, n_pad - N), (0, 0)))

    b1r = b1.reshape(1, d_ff)
    # Pack the three per-d_model parameter vectors into one block: one set of
    # pipeline buffers instead of three separate (1, d_model) inputs.
    p2 = jnp.stack([b2, gamma, beta])            # (3, d_model)

    kernel = functools.partial(_pwff_kernel, eps=eps)

    itemsize = jnp.dtype(x.dtype).itemsize
    cost = pl.CostEstimate(
        flops=4 * N * d_model * d_ff,            # two GEMMs
        transcendentals=N,                       # one rsqrt per token row
        bytes_accessed=(2 * N * d_model * itemsize
                        + (w1.size + w2.size) * jnp.dtype(w1.dtype).itemsize
                        + (b1.size + 3 * d_model) * 4),
    )

    out = pl.pallas_call(
        kernel,
        out_shape=jax.ShapeDtypeStruct((n_pad, d_model), x.dtype),
        grid=(n_pad // tm, nk),
        in_specs=[
            pl.BlockSpec((tm, d_model), lambda i, k: (i, 0)),     # x tile
            pl.BlockSpec((d_model, tff), lambda i, k: (0, k)),    # W1 tile
            pl.BlockSpec((1, tff), lambda i, k: (0, k)),          # b1 tile
            pl.BlockSpec((tff, d_model), lambda i, k: (k, 0)),    # W2 tile
            pl.BlockSpec((3, d_model), lambda i, k: (0, 0)),      # b2/gamma/beta
        ],
        out_specs=pl.BlockSpec((tm, d_model), lambda i, k: (i, 0)),
        scratch_shapes=[pltpu.VMEM((tm, d_model), jnp.float32)],
        compiler_params=pltpu.CompilerParams(
            dimension_semantics=("parallel", "arbitrary"),
            # Bounded working set (tiled d_ff); 48 MiB cap stays under v7x's
            # 64 MiB physical VMEM while giving v5e/v6e headroom over defaults.
            vmem_limit_bytes=48 * 1024 * 1024,
        ),
        cost_estimate=cost,
    )(x2, w1, b1r, w2, p2)

    return out[:N].reshape(B, S, d_model)


def _reference(x, w1, b1, w2, b2, gamma, beta, eps=1e-5):
    h = jnp.maximum(x @ w1 + b1, 0.0)
    y = h @ w2 + b2
    r = x + y
    mu = jnp.mean(r, axis=-1, keepdims=True)
    var = jnp.mean((r - mu) ** 2, axis=-1, keepdims=True)
    return (r - mu) / jnp.sqrt(var + eps) * gamma + beta


if __name__ == "__main__":
    # Small, TPU-friendly shapes consistent with the module (d_model, d_ff).
    B, S, d_model, d_ff = 2, 8, 256, 512

    key = jax.random.PRNGKey(0)
    kx, kw1, kb1, kw2, kb2 = jax.random.split(key, 5)

    x = jax.random.normal(kx, (B, S, d_model), dtype=jnp.float32)

    # Deterministic synthetic parameters (Linear weights stored as (in, out)).
    w1 = jax.random.normal(kw1, (d_model, d_ff), dtype=jnp.float32) * (1.0 / d_model ** 0.5)
    b1 = jax.random.normal(kb1, (d_ff,), dtype=jnp.float32) * 0.01
    w2 = jax.random.normal(kw2, (d_ff, d_model), dtype=jnp.float32) * (1.0 / d_ff ** 0.5)
    b2 = jax.random.normal(kb2, (d_model,), dtype=jnp.float32) * 0.01
    gamma = jnp.ones((d_model,), dtype=jnp.float32)
    beta = jnp.zeros((d_model,), dtype=jnp.float32)

    out = position_wise_ffn(x, w1, b1, w2, b2, gamma, beta)
    out = jax.block_until_ready(out)

    ref = _reference(x, w1, b1, w2, b2, gamma, beta)
    assert out.shape == (B, S, d_model)
    assert jnp.allclose(out, ref, atol=1e-4, rtol=1e-4), "mismatch vs reference"

    print("KERNEL_OK")
</pallas_src>

<mosaic_0001>
module attributes {stable_mosaic.version = 11 : i64} {
  func.func @_pwff_kernel(%arg0: i32, %arg1: i32, %arg2: memref<16x256xf32, #tpu.memory_space<vmem>>, %arg3: memref<256x512xf32, #tpu.memory_space<vmem>>, %arg4: memref<1x512xf32, #tpu.memory_space<vmem>>, %arg5: memref<512x256xf32, #tpu.memory_space<vmem>>, %arg6: memref<3x256xf32, #tpu.memory_space<vmem>>, %arg7: memref<16x256xf32, #tpu.memory_space<vmem>>, %arg8: memref<16x256xf32, #tpu.memory_space<vmem>>) attributes {dimension_semantics = [#tpu.dimension_semantics<parallel>, #tpu.dimension_semantics<arbitrary>], iteration_bounds = array<i64: 1, 1>, scalar_prefetch = 0 : i64, scratch_operands = 1 : i64, tpu.core_type = #tpu.core_type<tc>, window_params = [{transform_indices = @transform_0, window_bounds = array<i64: 16, 256>}, {transform_indices = @transform_1, window_bounds = array<i64: 256, 512>}, {transform_indices = @transform_2, window_bounds = array<i64: 1, 512>}, {transform_indices = @transform_3, window_bounds = array<i64: 512, 256>}, {pipeline_mode = #tpu.pipeline_mode<synchronous>, transform_indices = @transform_4, window_bounds = array<i64: 3, 256>}, {transform_indices = @transform_5, window_bounds = array<i64: 16, 256>}]} {
    %c0_i32 = arith.constant 0 : i32
    %0 = arith.cmpi eq, %arg1, %c0_i32 : i32
    %1 = arith.extui %0 : i1 to i32
    %c0_i32_0 = arith.constant 0 : i32
    %2 = arith.cmpi ne, %1, %c0_i32_0 : i32
    scf.if %2 {
      %cst_16 = arith.constant 0.000000e+00 : f32
      %19 = vector.broadcast %cst_16 : f32 to vector<16x256xf32>
      %c0_17 = arith.constant 0 : index
      %c0_18 = arith.constant 0 : index
      %20 = vector.load %arg8[%c0_17, %c0_18] : memref<16x256xf32, #tpu.memory_space<vmem>>, vector<16x256xf32>
      tpu.vector_store %arg8[%c0_17, %c0_18], %19 {strides = array<i32>} : memref<16x256xf32, #tpu.memory_space<vmem>>, vector<16x256xf32>,
    } else {
    }
    %c0 = arith.constant 0 : index
    %c0_1 = arith.constant 0 : index
    %3 = vector.load %arg2[%c0, %c0_1] : memref<16x256xf32, #tpu.memory_space<vmem>>, vector<16x256xf32>
    %c0_2 = arith.constant 0 : index
    %c0_3 = arith.constant 0 : index
    %4 = vector.load %arg3[%c0_2, %c0_3] : memref<256x512xf32, #tpu.memory_space<vmem>>, vector<256x512xf32>
    %cst = arith.constant dense<0.000000e+00> : vector<16x512xf32>
    %5 = tpu.matmul %3, %4, %cst {dimension_numbers = #tpu.dot_dimension_numbers<[1], [0], [0], [1], [0, 0, 1, 1], [], []>} : vector<16x256xf32>, vector<256x512xf32>, vector<16x512xf32> -> vector<16x512xf32>
    %c0_4 = arith.constant 0 : index
    %c0_5 = arith.constant 0 : index
    %6 = vector.load %arg4[%c0_4, %c0_5] : memref<1x512xf32, #tpu.memory_space<vmem>>, vector<1x512xf32>
    %7 = vector.broadcast %6 : vector<1x512xf32> to vector<16x512xf32>
    %8 = arith.addf %5, %7 : vector<16x512xf32>
    %cst_6 = arith.constant 0.000000e+00 : f32
    %9 = vector.broadcast %cst_6 : f32 to vector<16x512xf32>
    %10 = arith.maximumf %8, %9 : vector<16x512xf32>
    %c0_7 = arith.constant 0 : index
    %c0_8 = arith.constant 0 : index
    %11 = vector.load %arg8[%c0_7, %c0_8] : memref<16x256xf32, #tpu.memory_space<vmem>>, vector<16x256xf32>
    %c0_9 = arith.constant 0 : index
    %c0_10 = arith.constant 0 : index
    %12 = vector.load %arg5[%c0_9, %c0_10] : memref<512x256xf32, #tpu.memory_space<vmem>>, vector<512x256xf32>
    %cst_11 = arith.constant dense<0.000000e+00> : vector<16x256xf32>
    %13 = tpu.matmul %10, %12, %cst_11 {dimension_numbers = #tpu.dot_dimension_numbers<[1], [0], [0], [1], [0, 0, 1, 1], [], []>} : vector<16x512xf32>, vector<512x256xf32>, vector<16x256xf32> -> vector<16x256xf32>
    %14 = arith.addf %11, %13 : vector<16x256xf32>
    %c0_12 = arith.constant 0 : index
    %c0_13 = arith.constant 0 : index
    %15 = vector.load %arg8[%c0_12, %c0_13] : memref<16x256xf32, #tpu.memory_space<vmem>>, vector<16x256xf32>
    tpu.vector_store %arg8[%c0_12, %c0_13], %14 {strides = array<i32>} : memref<16x256xf32, #tpu.memory_space<vmem>>, vector<16x256xf32>,
    %c0_i32_14 = arith.constant 0 : i32
    %16 = arith.cmpi eq, %arg1, %c0_i32_14 : i32
    %17 = arith.extui %16 : i1 to i32
    %c0_i32_15 = arith.constant 0 : i32
    %18 = arith.cmpi ne, %17, %c0_i32_15 : i32
    scf.if %18 {
      %c0_16 = arith.constant 0 : index
      %c0_17 = arith.constant 0 : index
      %19 = vector.load %arg6[%c0_16, %c0_17] : memref<3x256xf32, #tpu.memory_space<vmem>>, vector<1x256xf32>
      %c1 = arith.constant 1 : index
      %c0_18 = arith.constant 0 : index
      %20 = vector.load %arg6[%c1, %c0_18] : memref<3x256xf32, #tpu.memory_space<vmem>>, vector<1x256xf32>
      %c2 = arith.constant 2 : index
      %c0_19 = arith.constant 0 : index
      %21 = vector.load %arg6[%c2, %c0_19] : memref<3x256xf32, #tpu.memory_space<vmem>>, vector<1x256xf32>
      %c0_20 = arith.constant 0 : index
      %c0_21 = arith.constant 0 : index
      %22 = vector.load %arg8[%c0_20, %c0_21] : memref<16x256xf32, #tpu.memory_space<vmem>>, vector<16x256xf32>
      %23 = arith.addf %3, %22 : vector<16x256xf32>
      %24 = vector.broadcast %19 : vector<1x256xf32> to vector<16x256xf32>
      %25 = arith.addf %23, %24 : vector<16x256xf32>
      %cst_22 = arith.constant dense<0.000000e+00> : vector<16xf32>
      %26 = vector.multi_reduction <add>, %25, %cst_22 [1] : vector<16x256xf32> to vector<16xf32>
      %27 = vector.shape_cast %26 : vector<16xf32> to vector<16x1xf32>
      %cst_23 = arith.constant 2.560000e+02 : f32
      %28 = vector.broadcast %cst_23 : f32 to vector<16x1xf32>
      %29 = arith.divf %27, %28 : vector<16x1xf32>
      %30 = arith.mulf %25, %25 : vector<16x256xf32>
      %cst_24 = arith.constant dense<0.000000e+00> : vector<16xf32>
      %31 = vector.multi_reduction <add>, %30, %cst_24 [1] : vector<16x256xf32> to vector<16xf32>
      %32 = vector.shape_cast %31 : vector<16xf32> to vector<16x1xf32>
      %cst_25 = arith.constant 2.560000e+02 : f32
      %33 = vector.broadcast %cst_25 : f32 to vector<16x1xf32>
      %34 = arith.divf %32, %33 : vector<16x1xf32>
      %35 = arith.mulf %29, %29 : vector<16x1xf32>
      %36 = arith.subf %34, %35 : vector<16x1xf32>
      %cst_26 = arith.constant 9.99999974E-6 : f32
      %37 = vector.broadcast %cst_26 : f32 to vector<16x1xf32>
      %38 = arith.addf %36, %37 : vector<16x1xf32>
      %39 = math.rsqrt %38 : vector<16x1xf32>
      %40 = vector.broadcast %29 : vector<16x1xf32> to vector<16x256xf32>
      %41 = arith.subf %25, %40 : vector<16x256xf32>
      %42 = vector.broadcast %39 : vector<16x1xf32> to vector<16x256xf32>
      %43 = arith.mulf %41, %42 : vector<16x256xf32>
      %44 = vector.broadcast %20 : vector<1x256xf32> to vector<16x256xf32>
      %45 = arith.mulf %43, %44 : vector<16x256xf32>
      %46 = vector.broadcast %21 : vector<1x256xf32> to vector<16x256xf32>
      %47 = arith.addf %45, %46 : vector<16x256xf32>
      %c0_27 = arith.constant 0 : index
      %c0_28 = arith.constant 0 : index
      %48 = vector.load %arg7[%c0_27, %c0_28] : memref<16x256xf32, #tpu.memory_space<vmem>>, vector<16x256xf32>
      tpu.vector_store %arg7[%c0_27, %c0_28], %47 {strides = array<i32>} : memref<16x256xf32, #tpu.memory_space<vmem>>, vector<16x256xf32>,
    } else {
    }
    return
  }
  func.func @transform_0(%arg0: i32, %arg1: i32) -> (i32, i32) {
    %c0_i32 = arith.constant 0 : i32
    %c0_i32_0 = arith.constant 0 : i32
    return %arg0, %c0_i32 : i32, i32
  }
  func.func @transform_1(%arg0: i32, %arg1: i32) -> (i32, i32) {
    %c0_i32 = arith.constant 0 : i32
    %c0_i32_0 = arith.constant 0 : i32
    return %c0_i32, %arg1 : i32, i32
  }
  func.func @transform_2(%arg0: i32, %arg1: i32) -> (i32, i32) {
    %c0_i32 = arith.constant 0 : i32
    %c0_i32_0 = arith.constant 0 : i32
    return %c0_i32, %arg1 : i32, i32
  }
  func.func @transform_3(%arg0: i32, %arg1: i32) -> (i32, i32) {
    %c0_i32 = arith.constant 0 : i32
    %c0_i32_0 = arith.constant 0 : i32
    return %arg1, %c0_i32 : i32, i32
  }
  func.func @transform_4(%arg0: i32, %arg1: i32) -> (i32, i32) {
    %c0_i32 = arith.constant 0 : i32
    %c0_i32_0 = arith.constant 0 : i32
    %c0_i32_1 = arith.constant 0 : i32
    return %c0_i32, %c0_i32_0 : i32, i32
  }
  func.func @transform_5(%arg0: i32, %arg1: i32) -> (i32, i32) {
    %c0_i32 = arith.constant 0 : i32
    %c0_i32_0 = arith.constant 0 : i32
    return %arg0, %c0_i32 : i32, i32
  }
}

</mosaic_0001>

<bundles_post_ra>
// kernel: tpu_custom_call.1
= control target key start
LH: loop header
LB: loop body
LE: loop exit
PB: predicated region body
PF: predicated region fallthrough
CT: control target
= control target key end

     0   :  { %10 = vsyncpa [#allocation4], 0  ;;  %s1065_s0 = inlined_call_operand.hbm [shape: f32[16,256], index: 0, kind: input, shape index: {}]   ;;  %s1066_s1 = inlined_call_operand.hbm [shape: f32[256,512], index: 1, kind: input, shape index: {}]   ;;  %s1067_s2 = inlined_call_operand.hbm [shape: f32[1,512], index: 2, kind: input, shape index: {}]   ;;  %s1068_s3 = inlined_call_operand.hbm [shape: f32[512,256], index: 3, kind: input, shape index: {}]   ;;  %s1069_s4 = inlined_call_operand.hbm [shape: f32[3,256], index: 4, kind: input, shape index: {}]   ;;  %s1070_s5 = inlined_call_operand.hbm [shape: f32[16,256], index: 5, kind: output, shape index: {}]  }
   0x1   :  { %11 = vsyncpa [#allocation7], 0 }
   0x2   :  { %12 = vsyncpa [#allocation10], 0 }
   0x3   :  { %13 = vsyncpa [#allocation5], 0  ;;  %s966_s18 = smov [#allocation6]  }
   0x4   :  { %s31_s19 = sshll.u32 %s966_s18, 4  ;;  %s32_s19 = int_to_ptr.vmem [resolvable:$true] %s31_s19 }
   0x5   :  { %s846_s20 = scalar_lea.vmem %s32_s19, 16384  ;;  %p851_p1 = scmp.lt.s32.totalorder %s32_s19, %s32_s19 }
   0x6   :  { %p847_p0 = scmp.ne.s32.totalorder %s32_s19, %s846_s20  ;;  %p852_p2 = scmp.lt.s32.totalorder %s846_s20, %s846_s20 }
   0x8   :  { %p853_p3 = por %p852_p2, %p851_p1 }
   0xa   :  { %p854_p4 = pnand %p853_p3, %p847_p0 }
   0xc   :  { %857 = shalt.err (!%p854_p4)
}
   0xd   :  { %s967_s21 = smov 512   ;;  %s968_s22 = smov 32  }
   0xe   :  { %37 = dma.hbm_to_vmem [thread:$0]  %s1066_s1, 16384, %s32_s19, [#allocation7], %s967_s21, %s967_s21, %s968_s22  }
   0xf   :  { %s969_s25 = smov [#allocation9]   ;;  %s970_s27 = smov [#allocation3]  }
  0x10   :  { %s53_s26 = sshll.u32 %s969_s25, 4  ;;  %s19_s28 = sshll.u32 %s970_s27, 4  ;;  %s54_s26 = int_to_ptr.vmem [resolvable:$true] %s53_s26  ;;  %s20_s28 = int_to_ptr.vmem [resolvable:$true] %s19_s28 }
  0x11   :  { %s866_s29 = scalar_lea.vmem %s54_s26, 16384  ;;  %p871_p6 = scmp.lt.s32.totalorder %s54_s26, %s54_s26 }
  0x12   :  { %p867_p5 = scmp.ne.s32.totalorder %s54_s26, %s866_s29  ;;  %p872_p7 = scmp.lt.s32.totalorder %s866_s29, %s866_s29 }
  0x14   :  { %p873_p8 = por %p872_p7, %p871_p6 }
  0x16   :  { %p874_p9 = pnand %p873_p8, %p867_p5 }
  0x18   :  { %877 = shalt.err (!%p874_p9)
}
  0x19   :  { %s971_s30 = smov 256   ;;  %s972_s6 = smov 16  }
  0x1a   :  { %59 = dma.hbm_to_vmem [thread:$0]  %s1068_s3, 16384, %s54_s26, [#allocation10], %s971_s30, %s971_s30, %s972_s6  }
  0x1b   :  { %s886_s1 = scalar_lea.vmem %s20_s28, 512  ;;  %p891_p11 = scmp.lt.s32.totalorder %s20_s28, %s20_s28 }
  0x1c   :  { %p887_p10 = scmp.ne.s32.totalorder %s20_s28, %s886_s1  ;;  %p892_p12 = scmp.lt.s32.totalorder %s886_s1, %s886_s1 }
  0x1e   :  { %p893_p13 = por %p892_p12, %p891_p11 }
  0x20   :  { %p894_p0 = pnand %p893_p13, %p887_p10 }
  0x22   :  { %897 = shalt.err (!%p894_p0)
}
  0x23   :  { %25 = dma.hbm_to_vmem [thread:$0]  %s1065_s0, 512, %s20_s28, [#allocation4], %s971_s30, %s971_s30, %s972_s6  }
  0x24   :  { %s973_s11 = smov [#allocation8]   ;;  %s974_s13 = smov [#allocation11]  }
  0x25   :  { %s44_s12 = sshll.u32 %s973_s11, 4  ;;  %s66_s3 = sshll.u32 %s974_s13, 4  ;;  %s45_s12 = int_to_ptr.vmem [resolvable:$true] %s44_s12  ;;  %s67_s3 = int_to_ptr.vmem [resolvable:$true] %s66_s3 }
  0x26   :  { %s906_s14 = scalar_lea.vmem %s45_s12, 64  ;;  %p911_p2 = scmp.lt.s32.totalorder %s45_s12, %s45_s12 }
  0x27   :  { %p907_p1 = scmp.ne.s32.totalorder %s45_s12, %s906_s14  ;;  %p912_p3 = scmp.lt.s32.totalorder %s906_s14, %s906_s14 }
  0x29   :  { %p913_p4 = por %p912_p3, %p911_p2 }
  0x2b   :  { %p914_p5 = pnand %p913_p4, %p907_p1 }
  0x2d   :  { %917 = shalt.err (!%p914_p5)
}
  0x2e   :  { %47 = dma.hbm_to_vmem [thread:$0]  %s1067_s2, 64, %s45_s12, [#allocation7]  }
  0x2f   :  { %s926_s17 = scalar_lea.vmem %s67_s3, 128  ;;  %p931_p7 = scmp.lt.s32.totalorder %s67_s3, %s67_s3 }
  0x30   :  { %p927_p6 = scmp.ne.s32.totalorder %s67_s3, %s926_s17  ;;  %p932_p8 = scmp.lt.s32.totalorder %s926_s17, %s926_s17 }
  0x32   :  { %p933_p9 = por %p932_p8, %p931_p7 }
  0x34   :  { %p934_p10 = pnand %p933_p9, %p927_p6 }
  0x36   :  { %937 = shalt.err (!%p934_p10)
}
  0x37   :  { %69 = dma.hbm_to_vmem [thread:$0]  %s1069_s4, 128, %s67_s3, [#allocation10]  }
  0x38   :  { %958 = dma.done.wait [#allocation4], 512  }
  0x39   :  { %959 = vsyncadd [#allocation4], 4294966784 }
  0x3a   :  { %960 = dma.done.wait [#allocation7], 16448  }
  0x3b   :  { %961 = vsyncadd [#allocation7], 4294950848 }
  0x3c   :  { %962 = dma.done.wait [#allocation10], 16512  }
  0x3d   :  { %963 = vsyncadd [#allocation10], 4294950784  ;;  %v158_v0 = vld [vmem:[#allocation6 + $0x1e8] sm:$0xff]  ;;  %v160_v1 = vld [vmem:[#allocation6 + $0x1f8] sm:$0xff]  ;;  %s975_s2 = smov [#allocation12]  }
  0x3e   :  { %v157_v2 = vld [vmem:[#allocation6 + $0x1e0] sm:$0xff]  ;;  %247 = vmatprep.subr.mxu0 %v158_v0  ;;  %324 = vmatprep.subr.mxu1 %v160_v1  ;;  %v159_v3 = vld [vmem:[#allocation6 + $0x1f0] sm:$0xff]  ;;  %v154_v4 = vld [vmem:[#allocation6 + $0x1c8] sm:$0xff]  ;;  %s810_s4 = sshll.u32 %s975_s2, 4  ;;  %s811_s4 = int_to_ptr.vmem [resolvable:$true] %s810_s4 }
  0x3f   :  { %v156_v5 = vld [vmem:[#allocation6 + $0x1d8] sm:$0xff]  ;;  %248 = vmatpush1.msra.mxu0 %v157_v2  ;;  %325 = vmatpush1.msra.mxu1 %v159_v3  ;;  %v153_v6 = vld [vmem:[#allocation6 + $0x1c0] sm:$0xff]  ;;  %v155_v7 = vld [vmem:[#allocation6 + $0x1d0] sm:$0xff]  ;;  %s938_s19 = scalar_lea.vmem %s811_s4, 512  ;;  %p943_p12 = scmp.lt.s32.totalorder %s811_s4, %s811_s4 }
  0x40   :  { %v150_v8 = vld [vmem:[#allocation6 + $0x1a8] sm:$0xff]  ;;  %249 = vmatprep.subr.mxu0 %v154_v4  ;;  %326 = vmatprep.subr.mxu1 %v156_v5  ;;  %v152_v9 = vld [vmem:[#allocation6 + $0x1b8] sm:$0xff]  ;;  %v149_v10 = vld [vmem:[#allocation6 + $0x1a0] sm:$0xff]  ;;  %p939_p11 = scmp.ne.s32.totalorder %s811_s4, %s938_s19  ;;  %p944_p13 = scmp.lt.s32.totalorder %s938_s19, %s938_s19 }
  0x41   :  { %v151_v11 = vld [vmem:[#allocation6 + $0x1b0] sm:$0xff]  ;;  %250 = vmatpush1.msra.mxu0 %v153_v6  ;;  %327 = vmatpush1.msra.mxu1 %v155_v7  ;;  %v146_v12 = vld [vmem:[#allocation6 + $0x188] sm:$0xff]  ;;  %v148_v13 = vld [vmem:[#allocation6 + $0x198] sm:$0xff] }
  0x42   :  { %251 = vmatprep.subr.mxu0 %v150_v8  ;;  %328 = vmatprep.subr.mxu1 %v152_v9  ;;  %v145_v14 = vld [vmem:[#allocation6 + $0x180] sm:$0xff]  ;;  %v147_v15 = vld [vmem:[#allocation6 + $0x190] sm:$0xff]  ;;  %v142_v16 = vld [vmem:[#allocation6 + $0x168] sm:$0xff]  ;;  %p945_p0 = por %p944_p13, %p943_p12 }
  0x43   :  { %252 = vmatpush1.msra.mxu0 %v149_v10  ;;  %329 = vmatpush1.msra.mxu1 %v151_v11  ;;  %v144_v17 = vld [vmem:[#allocation6 + $0x178] sm:$0xff]  ;;  %v141_v18 = vld [vmem:[#allocation6 + $0x160] sm:$0xff]  ;;  %v143_v19 = vld [vmem:[#allocation6 + $0x170] sm:$0xff] }
  0x44   :  { %253 = vmatprep.subr.mxu0 %v146_v12  ;;  %330 = vmatprep.subr.mxu1 %v148_v13  ;;  %v138_v20 = vld [vmem:[#allocation6 + $0x148] sm:$0xff]  ;;  %v140_v21 = vld [vmem:[#allocation6 + $0x158] sm:$0xff]  ;;  %v137_v22 = vld [vmem:[#allocation6 + $0x140] sm:$0xff]  ;;  %p946_p1 = pnand %p945_p0, %p939_p11 }
  0x45   :  { %254 = vmatpush1.msra.mxu0 %v145_v14  ;;  %331 = vmatpush1.msra.mxu1 %v147_v15  ;;  %v139_v23 = vld [vmem:[#allocation6 + $0x150] sm:$0xff]  ;;  %v134_v24 = vld [vmem:[#allocation6 + $0x128] sm:$0xff]  ;;  %v136_v25 = vld [vmem:[#allocation6 + $0x138] sm:$0xff] }
  0x46   :  { %255 = vmatprep.subr.mxu0 %v142_v16  ;;  %332 = vmatprep.subr.mxu1 %v144_v17  ;;  %v133_v26 = vld [vmem:[#allocation6 + $0x120] sm:$0xff]  ;;  %v135_v27 = vld [vmem:[#allocation6 + $0x130] sm:$0xff]  ;;  %v130_v28 = vld [vmem:[#allocation6 + $0x108] sm:$0xff] }
  0x47   :  { %256 = vmatpush1.msra.mxu0 %v141_v18  ;;  %333 = vmatpush1.msra.mxu1 %v143_v19  ;;  %v132_v29 = vld [vmem:[#allocation6 + $0x118] sm:$0xff]  ;;  %v129_v30 = vld [vmem:[#allocation6 + $0x100] sm:$0xff]  ;;  %v131_v31 = vld [vmem:[#allocation6 + $0x110] sm:$0xff] }
  0x48   :  { %257 = vmatprep.subr.mxu0 %v138_v20  ;;  %334 = vmatprep.subr.mxu1 %v140_v21  ;;  %v126_v32 = vld [vmem:[#allocation6 + $0xe8] sm:$0xff]  ;;  %v128_v33 = vld [vmem:[#allocation6 + $0xf8] sm:$0xff]  ;;  %v125_v34 = vld [vmem:[#allocation6 + $0xe0] sm:$0xff] }
  0x49   :  { %258 = vmatpush1.msra.mxu0 %v137_v22  ;;  %335 = vmatpush1.msra.mxu1 %v139_v23  ;;  %v127_v35 = vld [vmem:[#allocation6 + $0xf0] sm:$0xff]  ;;  %v122_v36 = vld [vmem:[#allocation6 + $0xc8] sm:$0xff]  ;;  %v124_v37 = vld [vmem:[#allocation6 + $0xd8] sm:$0xff] }
  0x4a   :  { %259 = vmatprep.subr.mxu0 %v134_v24  ;;  %336 = vmatprep.subr.mxu1 %v136_v25  ;;  %v121_v38 = vld [vmem:[#allocation6 + $0xc0] sm:$0xff]  ;;  %v123_v39 = vld [vmem:[#allocation6 + $0xd0] sm:$0xff]  ;;  %v118_v40 = vld [vmem:[#allocation6 + $0xa8] sm:$0xff] }
  0x4b   :  { %260 = vmatpush1.msra.mxu0 %v133_v26  ;;  %337 = vmatpush1.msra.mxu1 %v135_v27  ;;  %v120_v41 = vld [vmem:[#allocation6 + $0xb8] sm:$0xff]  ;;  %v117_v42 = vld [vmem:[#allocation6 + $0xa0] sm:$0xff]  ;;  %v119_v43 = vld [vmem:[#allocation6 + $0xb0] sm:$0xff] }
  0x4c   :  { %261 = vmatprep.subr.mxu0 %v130_v28  ;;  %338 = vmatprep.subr.mxu1 %v132_v29  ;;  %v114_v44 = vld [vmem:[#allocation6 + $0x88] sm:$0xff]  ;;  %v116_v45 = vld [vmem:[#allocation6 + $0x98] sm:$0xff]  ;;  %v113_v46 = vld [vmem:[#allocation6 + $0x80] sm:$0xff] }
  0x4d   :  { %262 = vmatpush1.msra.mxu0 %v129_v30  ;;  %339 = vmatpush1.msra.mxu1 %v131_v31  ;;  %v115_v47 = vld [vmem:[#allocation6 + $0x90] sm:$0xff]  ;;  %v110_v48 = vld [vmem:[#allocation6 + $0x68] sm:$0xff]  ;;  %v112_v49 = vld [vmem:[#allocation6 + $0x78] sm:$0xff] }
  0x4e   :  { %263 = vmatprep.subr.mxu0 %v126_v32  ;;  %340 = vmatprep.subr.mxu1 %v128_v33  ;;  %v109_v50 = vld [vmem:[#allocation6 + $0x60] sm:$0xff]  ;;  %v111_v51 = vld [vmem:[#allocation6 + $0x70] sm:$0xff]  ;;  %v106_v52 = vld [vmem:[#allocation6 + $0x48] sm:$0xff] }
  0x4f   :  { %264 = vmatpush1.msra.mxu0 %v125_v34  ;;  %341 = vmatpush1.msra.mxu1 %v127_v35  ;;  %v108_v53 = vld [vmem:[#allocation6 + $0x58] sm:$0xff]  ;;  %v105_v54 = vld [vmem:[#allocation6 + $0x40] sm:$0xff]  ;;  %v107_v55 = vld [vmem:[#allocation6 + $0x50] sm:$0xff] }
  0x50   :  { %265 = vmatprep.subr.mxu0 %v122_v36  ;;  %342 = vmatprep.subr.mxu1 %v124_v37  ;;  %v102_v56 = vld [vmem:[#allocation6 + $0x28] sm:$0xff]  ;;  %v104_v57 = vld [vmem:[#allocation6 + $0x38] sm:$0xff]  ;;  %v101_v58 = vld [vmem:[#allocation6 + $0x20] sm:$0xff] }
  0x51   :  { %266 = vmatpush1.msra.mxu0 %v121_v38  ;;  %343 = vmatpush1.msra.mxu1 %v123_v39  ;;  %v103_v59 = vld [vmem:[#allocation6 + $0x30] sm:$0xff]  ;;  %v98_v60 = vld [vmem:[#allocation6 + $0x8] sm:$0xff]  ;;  %v100_v61 = vld [vmem:[#allocation6 + $0x18] sm:$0xff] }
  0x52   :  { %267 = vmatprep.subr.mxu0 %v118_v40  ;;  %344 = vmatprep.subr.mxu1 %v120_v41  ;;  %v97_v62 = vld [vmem:[#allocation6] sm:$0xff]  ;;  %v99_v63 = vld [vmem:[#allocation6 + $0x10] sm:$0xff]  ;;  %v222_v0 = vld [vmem:[#allocation6 + $0x3e8] sm:$0xff] }
  0x53   :  { %268 = vmatpush1.msra.mxu0 %v117_v42  ;;  %345 = vmatpush1.msra.mxu1 %v119_v43  ;;  %v224_v1 = vld [vmem:[#allocation6 + $0x3f8] sm:$0xff]  ;;  %v221_v2 = vld [vmem:[#allocation6 + $0x3e0] sm:$0xff]  ;;  %v223_v3 = vld [vmem:[#allocation6 + $0x3f0] sm:$0xff] }
  0x54   :  { %269 = vmatprep.subr.mxu0 %v114_v44  ;;  %346 = vmatprep.subr.mxu1 %v116_v45  ;;  %v218_v4 = vld [vmem:[#allocation6 + $0x3c8] sm:$0xff]  ;;  %v220_v5 = vld [vmem:[#allocation6 + $0x3d8] sm:$0xff]  ;;  %v217_v6 = vld [vmem:[#allocation6 + $0x3c0] sm:$0xff] }
  0x55   :  { %270 = vmatpush1.msra.mxu0 %v113_v46  ;;  %347 = vmatpush1.msra.mxu1 %v115_v47  ;;  %v219_v7 = vld [vmem:[#allocation6 + $0x3d0] sm:$0xff]  ;;  %v214_v8 = vld [vmem:[#allocation6 + $0x3a8] sm:$0xff]  ;;  %v216_v9 = vld [vmem:[#allocation6 + $0x3b8] sm:$0xff] }
  0x56   :  { %271 = vmatprep.subr.mxu0 %v110_v48  ;;  %348 = vmatprep.subr.mxu1 %v112_v49  ;;  %v213_v10 = vld [vmem:[#allocation6 + $0x3a0] sm:$0xff]  ;;  %v215_v11 = vld [vmem:[#allocation6 + $0x3b0] sm:$0xff]  ;;  %v210_v12 = vld [vmem:[#allocation6 + $0x388] sm:$0xff] }
  0x57   :  { %272 = vmatpush1.msra.mxu0 %v109_v50  ;;  %349 = vmatpush1.msra.mxu1 %v111_v51  ;;  %v212_v13 = vld [vmem:[#allocation6 + $0x398] sm:$0xff]  ;;  %v209_v14 = vld [vmem:[#allocation6 + $0x380] sm:$0xff]  ;;  %v211_v15 = vld [vmem:[#allocation6 + $0x390] sm:$0xff] }
  0x58   :  { %273 = vmatprep.subr.mxu0 %v106_v52  ;;  %350 = vmatprep.subr.mxu1 %v108_v53  ;;  %v206_v16 = vld [vmem:[#allocation6 + $0x368] sm:$0xff]  ;;  %v208_v17 = vld [vmem:[#allocation6 + $0x378] sm:$0xff]  ;;  %v205_v18 = vld [vmem:[#allocation6 + $0x360] sm:$0xff] }
  0x59   :  { %274 = vmatpush1.msra.mxu0 %v105_v54  ;;  %351 = vmatpush1.msra.mxu1 %v107_v55  ;;  %v207_v19 = vld [vmem:[#allocation6 + $0x370] sm:$0xff]  ;;  %v202_v20 = vld [vmem:[#allocation6 + $0x348] sm:$0xff]  ;;  %v204_v21 = vld [vmem:[#allocation6 + $0x358] sm:$0xff] }
  0x5a   :  { %275 = vmatprep.subr.mxu0 %v102_v56  ;;  %352 = vmatprep.subr.mxu1 %v104_v57  ;;  %v201_v22 = vld [vmem:[#allocation6 + $0x340] sm:$0xff]  ;;  %v203_v23 = vld [vmem:[#allocation6 + $0x350] sm:$0xff]  ;;  %v198_v24 = vld [vmem:[#allocation6 + $0x328] sm:$0xff] }
  0x5b   :  { %276 = vmatpush1.msra.mxu0 %v101_v58  ;;  %353 = vmatpush1.msra.mxu1 %v103_v59  ;;  %v200_v25 = vld [vmem:[#allocation6 + $0x338] sm:$0xff]  ;;  %v197_v26 = vld [vmem:[#allocation6 + $0x320] sm:$0xff]  ;;  %v199_v27 = vld [vmem:[#allocation6 + $0x330] sm:$0xff] }
  0x5c   :  { %277 = vmatprep.subr.mxu0 %v98_v60  ;;  %354 = vmatprep.subr.mxu1 %v100_v61  ;;  %v194_v28 = vld [vmem:[#allocation6 + $0x308] sm:$0xff]  ;;  %v196_v29 = vld [vmem:[#allocation6 + $0x318] sm:$0xff]  ;;  %v193_v30 = vld [vmem:[#allocation6 + $0x300] sm:$0xff] }
  0x5d   :  { %278 = vmatpush1.msra.mxu0 %v97_v62  ;;  %355 = vmatpush1.msra.mxu1 %v99_v63  ;;  %v195_v31 = vld [vmem:[#allocation6 + $0x310] sm:$0xff]  ;;  %v190_v32 = vld [vmem:[#allocation6 + $0x2e8] sm:$0xff]  ;;  %v192_v33 = vld [vmem:[#allocation6 + $0x2f8] sm:$0xff] }
  0x5e   :  { %279 = vmatprep.subr.mxu0 %v222_v0  ;;  %356 = vmatprep.subr.mxu1 %v224_v1  ;;  %v189_v34 = vld [vmem:[#allocation6 + $0x2e0] sm:$0xff]  ;;  %v191_v35 = vld [vmem:[#allocation6 + $0x2f0] sm:$0xff]  ;;  %v186_v36 = vld [vmem:[#allocation6 + $0x2c8] sm:$0xff] }
  0x5f   :  { %280 = vmatpush2.msra.mxu0 %v221_v2  ;;  %357 = vmatpush2.msra.mxu1 %v223_v3  ;;  %v188_v37 = vld [vmem:[#allocation6 + $0x2d8] sm:$0xff]  ;;  %v185_v38 = vld [vmem:[#allocation6 + $0x2c0] sm:$0xff]  ;;  %v187_v39 = vld [vmem:[#allocation6 + $0x2d0] sm:$0xff] }
  0x60   :  { %281 = vmatprep.subr.mxu0 %v218_v4  ;;  %358 = vmatprep.subr.mxu1 %v220_v5  ;;  %v182_v40 = vld [vmem:[#allocation6 + $0x2a8] sm:$0xff]  ;;  %v184_v41 = vld [vmem:[#allocation6 + $0x2b8] sm:$0xff]  ;;  %v181_v42 = vld [vmem:[#allocation6 + $0x2a0] sm:$0xff] }
  0x61   :  { %282 = vmatpush2.msra.mxu0 %v217_v6  ;;  %359 = vmatpush2.msra.mxu1 %v219_v7  ;;  %v183_v43 = vld [vmem:[#allocation6 + $0x2b0] sm:$0xff]  ;;  %v178_v44 = vld [vmem:[#allocation6 + $0x288] sm:$0xff]  ;;  %v180_v45 = vld [vmem:[#allocation6 + $0x298] sm:$0xff] }
  0x62   :  { %283 = vmatprep.subr.mxu0 %v214_v8  ;;  %360 = vmatprep.subr.mxu1 %v216_v9  ;;  %v177_v46 = vld [vmem:[#allocation6 + $0x280] sm:$0xff]  ;;  %v179_v47 = vld [vmem:[#allocation6 + $0x290] sm:$0xff]  ;;  %v174_v48 = vld [vmem:[#allocation6 + $0x268] sm:$0xff] }
  0x63   :  { %284 = vmatpush2.msra.mxu0 %v213_v10  ;;  %361 = vmatpush2.msra.mxu1 %v215_v11  ;;  %v176_v49 = vld [vmem:[#allocation6 + $0x278] sm:$0xff]  ;;  %v173_v50 = vld [vmem:[#allocation6 + $0x260] sm:$0xff]  ;;  %v175_v51 = vld [vmem:[#allocation6 + $0x270] sm:$0xff] }
  0x64   :  { %285 = vmatprep.subr.mxu0 %v210_v12  ;;  %362 = vmatprep.subr.mxu1 %v212_v13  ;;  %v170_v52 = vld [vmem:[#allocation6 + $0x248] sm:$0xff]  ;;  %v172_v53 = vld [vmem:[#allocation6 + $0x258] sm:$0xff]  ;;  %v169_v54 = vld [vmem:[#allocation6 + $0x240] sm:$0xff] }
  0x65   :  { %286 = vmatpush2.msra.mxu0 %v209_v14  ;;  %363 = vmatpush2.msra.mxu1 %v211_v15  ;;  %v171_v55 = vld [vmem:[#allocation6 + $0x250] sm:$0xff]  ;;  %v166_v56 = vld [vmem:[#allocation6 + $0x228] sm:$0xff]  ;;  %v168_v57 = vld [vmem:[#allocation6 + $0x238] sm:$0xff] }
  0x66   :  { %287 = vmatprep.subr.mxu0 %v206_v16  ;;  %364 = vmatprep.subr.mxu1 %v208_v17  ;;  %v165_v58 = vld [vmem:[#allocation6 + $0x220] sm:$0xff]  ;;  %v167_v59 = vld [vmem:[#allocation6 + $0x230] sm:$0xff]  ;;  %v162_v60 = vld [vmem:[#allocation6 + $0x208] sm:$0xff] }
  0x67   :  { %288 = vmatpush2.msra.mxu0 %v205_v18  ;;  %365 = vmatpush2.msra.mxu1 %v207_v19  ;;  %v164_v61 = vld [vmem:[#allocation6 + $0x218] sm:$0xff]  ;;  %v161_v62 = vld [vmem:[#allocation6 + $0x200] sm:$0xff]  ;;  %v1027_v63 = vld [vmem:[#allocation3 + $0x8] sm:$0xff] }
  0x68   :  { %289 = vmatprep.subr.mxu0 %v202_v20  ;;  %366 = vmatprep.subr.mxu1 %v204_v21  ;;  %v163_v0 = vld [vmem:[#allocation6 + $0x210] sm:$0xff]  ;;  %v1029_v1 = vld [vmem:[#allocation3] sm:$0xff]  ;;  %v1032_v2 = vld [vmem:[#allocation3 + $0x18] sm:$0xff] }
  0x69   :  { %290 = vmatpush2.msra.mxu0 %v201_v22  ;;  %367 = vmatpush2.msra.mxu1 %v203_v23  ;;  %v444_v3 = vld [vmem:[#allocation9 + $0xf8] sm:$0xff]  ;;  %v443_v5 = vld [vmem:[#allocation9 + $0xf0] sm:$0xff]  ;;  %v442_v8 = vld [vmem:[#allocation9 + $0xe8] sm:$0xff] }
  0x6a   :  { %291 = vmatprep.subr.mxu0 %v198_v24  ;;  %368 = vmatprep.subr.mxu1 %v200_v25  ;;  %v508_v4 = vld [vmem:[#allocation9 + $0x2f8] sm:$0xff]  ;;  %v507_v6 = vld [vmem:[#allocation9 + $0x2f0] sm:$0xff]  ;;  %v506_v9 = vld [vmem:[#allocation9 + $0x2e8] sm:$0xff] }
  0x6b   :  { %292 = vmatpush2.msra.mxu0 %v197_v26  ;;  %369 = vmatpush2.msra.mxu1 %v199_v27  ;;  %v1039_v7 = vld [vmem:[#allocation3 + $0x10] sm:$0xff]  ;;  %v441_v10 = vld [vmem:[#allocation9 + $0xe0] sm:$0xff]  ;;  %v440_v12 = vld [vmem:[#allocation9 + $0xd8] sm:$0xff] }
  0x6c   :  { %293 = vmatprep.subr.mxu0 %v194_v28  ;;  %370 = vmatprep.subr.mxu1 %v196_v29  ;;  %v505_v11 = vld [vmem:[#allocation9 + $0x2e0] sm:$0xff]  ;;  %v504_v13 = vld [vmem:[#allocation9 + $0x2d8] sm:$0xff]  ;;  %v439_v14 = vld [vmem:[#allocation9 + $0xd0] sm:$0xff] }
  0x6d   :  { %294 = vmatpush2.msra.mxu0 %v193_v30  ;;  %371 = vmatpush2.msra.mxu1 %v195_v31  ;;  %v503_v15 = vld [vmem:[#allocation9 + $0x2d0] sm:$0xff]  ;;  %v438_v16 = vld [vmem:[#allocation9 + $0xc8] sm:$0xff]  ;;  %v437_v18 = vld [vmem:[#allocation9 + $0xc0] sm:$0xff] }
  0x6e   :  { %295 = vmatprep.subr.mxu0 %v190_v32  ;;  %372 = vmatprep.subr.mxu1 %v192_v33  ;;  %v502_v17 = vld [vmem:[#allocation9 + $0x2c8] sm:$0xff]  ;;  %v501_v19 = vld [vmem:[#allocation9 + $0x2c0] sm:$0xff]  ;;  %v436_v20 = vld [vmem:[#allocation9 + $0xb8] sm:$0xff] }
  0x6f   :  { %296 = vmatpush2.msra.mxu0 %v189_v34  ;;  %373 = vmatpush2.msra.mxu1 %v191_v35  ;;  %v500_v21 = vld [vmem:[#allocation9 + $0x2b8] sm:$0xff]  ;;  %v435_v22 = vld [vmem:[#allocation9 + $0xb0] sm:$0xff]  ;;  %v434_v24 = vld [vmem:[#allocation9 + $0xa8] sm:$0xff] }
  0x70   :  { %297 = vmatprep.subr.mxu0 %v186_v36  ;;  %374 = vmatprep.subr.mxu1 %v188_v37  ;;  %v499_v23 = vld [vmem:[#allocation9 + $0x2b0] sm:$0xff]  ;;  %v498_v25 = vld [vmem:[#allocation9 + $0x2a8] sm:$0xff]  ;;  %v433_v26 = vld [vmem:[#allocation9 + $0xa0] sm:$0xff] }
  0x71   :  { %298 = vmatpush2.msra.mxu0 %v185_v38  ;;  %375 = vmatpush2.msra.mxu1 %v187_v39  ;;  %v497_v27 = vld [vmem:[#allocation9 + $0x2a0] sm:$0xff]  ;;  %v432_v28 = vld [vmem:[#allocation9 + $0x98] sm:$0xff]  ;;  %v431_v30 = vld [vmem:[#allocation9 + $0x90] sm:$0xff] }
  0x72   :  { %299 = vmatprep.subr.mxu0 %v182_v40  ;;  %376 = vmatprep.subr.mxu1 %v184_v41  ;;  %v496_v29 = vld [vmem:[#allocation9 + $0x298] sm:$0xff]  ;;  %v495_v31 = vld [vmem:[#allocation9 + $0x290] sm:$0xff]  ;;  %v430_v32 = vld [vmem:[#allocation9 + $0x88] sm:$0xff] }
  0x73   :  { %300 = vmatpush2.msra.mxu0 %v181_v42  ;;  %377 = vmatpush2.msra.mxu1 %v183_v43  ;;  %v494_v33 = vld [vmem:[#allocation9 + $0x288] sm:$0xff]  ;;  %v429_v34 = vld [vmem:[#allocation9 + $0x80] sm:$0xff]  ;;  %v428_v36 = vld [vmem:[#allocation9 + $0x78] sm:$0xff] }
  0x74   :  { %301 = vmatprep.subr.mxu0 %v178_v44  ;;  %378 = vmatprep.subr.mxu1 %v180_v45  ;;  %v493_v35 = vld [vmem:[#allocation9 + $0x280] sm:$0xff]  ;;  %v492_v37 = vld [vmem:[#allocation9 + $0x278] sm:$0xff]  ;;  %v427_v38 = vld [vmem:[#allocation9 + $0x70] sm:$0xff] }
  0x75   :  { %302 = vmatpush2.msra.mxu0 %v177_v46  ;;  %379 = vmatpush2.msra.mxu1 %v179_v47  ;;  %v491_v39 = vld [vmem:[#allocation9 + $0x270] sm:$0xff]  ;;  %v426_v40 = vld [vmem:[#allocation9 + $0x68] sm:$0xff]  ;;  %v425_v42 = vld [vmem:[#allocation9 + $0x60] sm:$0xff] }
  0x76   :  { %303 = vmatprep.subr.mxu0 %v174_v48  ;;  %380 = vmatprep.subr.mxu1 %v176_v49  ;;  %v490_v41 = vld [vmem:[#allocation9 + $0x268] sm:$0xff]  ;;  %v489_v43 = vld [vmem:[#allocation9 + $0x260] sm:$0xff]  ;;  %v424_v44 = vld [vmem:[#allocation9 + $0x58] sm:$0xff] }
  0x77   :  { %304 = vmatpush2.msra.mxu0 %v173_v50  ;;  %381 = vmatpush2.msra.mxu1 %v175_v51  ;;  %v488_v45 = vld [vmem:[#allocation9 + $0x258] sm:$0xff]  ;;  %v423_v46 = vld [vmem:[#allocation9 + $0x50] sm:$0xff]  ;;  %v422_v48 = vld [vmem:[#allocation9 + $0x48] sm:$0xff] }
  0x78   :  { %305 = vmatprep.subr.mxu0 %v170_v52  ;;  %382 = vmatprep.subr.mxu1 %v172_v53  ;;  %v487_v47 = vld [vmem:[#allocation9 + $0x250] sm:$0xff]  ;;  %v486_v49 = vld [vmem:[#allocation9 + $0x248] sm:$0xff]  ;;  %v421_v50 = vld [vmem:[#allocation9 + $0x40] sm:$0xff] }
  0x79   :  { %306 = vmatpush2.msra.mxu0 %v169_v54  ;;  %383 = vmatpush2.msra.mxu1 %v171_v55  ;;  %v485_v51 = vld [vmem:[#allocation9 + $0x240] sm:$0xff]  ;;  %v420_v52 = vld [vmem:[#allocation9 + $0x38] sm:$0xff]  ;;  %v419_v54 = vld [vmem:[#allocation9 + $0x30] sm:$0xff] }
  0x7a   :  { %307 = vmatprep.subr.mxu0 %v166_v56  ;;  %384 = vmatprep.subr.mxu1 %v168_v57  ;;  %v484_v53 = vld [vmem:[#allocation9 + $0x238] sm:$0xff]  ;;  %v483_v55 = vld [vmem:[#allocation9 + $0x230] sm:$0xff]  ;;  %v418_v56 = vld [vmem:[#allocation9 + $0x28] sm:$0xff] }
  0x7b   :  { %308 = vmatpush2.msra.mxu0 %v165_v58  ;;  %385 = vmatpush2.msra.mxu1 %v167_v59  ;;  %v482_v57 = vld [vmem:[#allocation9 + $0x228] sm:$0xff]  ;;  %v417_v58 = vld [vmem:[#allocation9 + $0x20] sm:$0xff] }
  0x7c   :  { %309 = vmatprep.subr.mxu0 %v162_v60  ;;  %386 = vmatprep.subr.mxu1 %v164_v61  ;;  %v481_v59 = vld [vmem:[#allocation9 + $0x220] sm:$0xff]  ;;  %v416_v60 = vld [vmem:[#allocation9 + $0x18] sm:$0xff] }
  0x7d   :  { %310 = vmatpush2.msra.mxu0 %v161_v62  ;;  %311 = vmatprep.mubr.f32.mxu0 %v1027_v63  ;;  %v480_v61 = vld [vmem:[#allocation9 + $0x218] sm:$0xff]  ;;  %v415_v62 = vld [vmem:[#allocation9 + $0x10] sm:$0xff] }
  0x7e   :  { %387 = vmatpush2.msra.mxu1 %v163_v0  ;;  %388 = vmatprep.mubr.f32.mxu1 %v1027_v63  ;;  %v479_v0 = vld [vmem:[#allocation9 + $0x210] sm:$0xff] }
  0x7f   :  { %312 = vmatmul.mubr.f32.vlgmr.msra.gmra.mxu0 %v1029_v1  ;;  %389 = vmatmul.mubr.f32.vlgmr.msra.gmra.mxu1 %v1029_v1 }
  0x80   :  { %317 = vmatprep.mubr.f32.mxu0 %v1032_v2  ;;  %394 = vmatprep.mubr.f32.mxu1 %v1032_v2 }
  0x81   :  { %541 = vmatprep.subr.mxu0 %v444_v3  ;;  %618 = vmatprep.subr.mxu1 %v508_v4  ;;  %v414_v3 = vld [vmem:[#allocation9 + $0x8] sm:$0xff] }
  0x82   :  { %542 = vmatpush1.msra.mxu0 %v443_v5  ;;  %619 = vmatpush1.msra.mxu1 %v507_v6  ;;  %v478_v4 = vld [vmem:[#allocation9 + $0x208] sm:$0xff]  ;;  %v413_v5 = vld [vmem:[#allocation9] sm:$0xff] }
  0x83   :  { %318 = vmatmul.mubr.f32.gmra.mxu0 %v1039_v7  ;;  %395 = vmatmul.mubr.f32.gmra.mxu1 %v1039_v7  ;;  %v477_v6 = vld [vmem:[#allocation9 + $0x200] sm:$0xff] }
  0x84   :  { %543 = vmatprep.subr.mxu0 %v442_v8  ;;  %620 = vmatprep.subr.mxu1 %v506_v9  ;;  %v476_v8 = vld [vmem:[#allocation9 + $0x1f8] sm:$0xff] }
  0x85   :  { %544 = vmatpush1.msra.mxu0 %v441_v10  ;;  %621 = vmatpush1.msra.mxu1 %v505_v11  ;;  %v540_v9 = vld [vmem:[#allocation9 + $0x3f8] sm:$0xff]  ;;  %v475_v10 = vld [vmem:[#allocation9 + $0x1f0] sm:$0xff] }
  0x86   :  { %545 = vmatprep.subr.mxu0 %v440_v12  ;;  %622 = vmatprep.subr.mxu1 %v504_v13  ;;  %v539_v11 = vld [vmem:[#allocation9 + $0x3f0] sm:$0xff]  ;;  %v474_v12 = vld [vmem:[#allocation9 + $0x1e8] sm:$0xff] }
  0x87   :  { %546 = vmatpush1.msra.mxu0 %v439_v14  ;;  %623 = vmatpush1.msra.mxu1 %v503_v15  ;;  %v538_v13 = vld [vmem:[#allocation9 + $0x3e8] sm:$0xff]  ;;  %v473_v14 = vld [vmem:[#allocation9 + $0x1e0] sm:$0xff] }
  0x88   :  { %547 = vmatprep.subr.mxu0 %v438_v16  ;;  %624 = vmatprep.subr.mxu1 %v502_v17  ;;  %v537_v15 = vld [vmem:[#allocation9 + $0x3e0] sm:$0xff]  ;;  %v472_v16 = vld [vmem:[#allocation9 + $0x1d8] sm:$0xff] }
  0x89   :  { %548 = vmatpush1.msra.mxu0 %v437_v18  ;;  %625 = vmatpush1.msra.mxu1 %v501_v19  ;;  %v536_v17 = vld [vmem:[#allocation9 + $0x3d8] sm:$0xff]  ;;  %v471_v18 = vld [vmem:[#allocation9 + $0x1d0] sm:$0xff] }
  0x8a   :  { %549 = vmatprep.subr.mxu0 %v436_v20  ;;  %626 = vmatprep.subr.mxu1 %v500_v21  ;;  %v535_v19 = vld [vmem:[#allocation9 + $0x3d0] sm:$0xff]  ;;  %v470_v20 = vld [vmem:[#allocation9 + $0x1c8] sm:$0xff] }
  0x8b   :  { %550 = vmatpush1.msra.mxu0 %v435_v22  ;;  %627 = vmatpush1.msra.mxu1 %v499_v23  ;;  %v534_v21 = vld [vmem:[#allocation9 + $0x3c8] sm:$0xff]  ;;  %v469_v22 = vld [vmem:[#allocation9 + $0x1c0] sm:$0xff] }
  0x8c   :  { %551 = vmatprep.subr.mxu0 %v434_v24  ;;  %628 = vmatprep.subr.mxu1 %v498_v25  ;;  %v533_v23 = vld [vmem:[#allocation9 + $0x3c0] sm:$0xff]  ;;  %v468_v24 = vld [vmem:[#allocation9 + $0x1b8] sm:$0xff] }
  0x8d   :  { %552 = vmatpush1.msra.mxu0 %v433_v26  ;;  %629 = vmatpush1.msra.mxu1 %v497_v27  ;;  %v532_v25 = vld [vmem:[#allocation9 + $0x3b8] sm:$0xff]  ;;  %v467_v26 = vld [vmem:[#allocation9 + $0x1b0] sm:$0xff] }
  0x8e   :  { %553 = vmatprep.subr.mxu0 %v432_v28  ;;  %630 = vmatprep.subr.mxu1 %v496_v29  ;;  %v531_v27 = vld [vmem:[#allocation9 + $0x3b0] sm:$0xff]  ;;  %v466_v28 = vld [vmem:[#allocation9 + $0x1a8] sm:$0xff] }
  0x8f   :  { %554 = vmatpush1.msra.mxu0 %v431_v30  ;;  %631 = vmatpush1.msra.mxu1 %v495_v31  ;;  %v530_v29 = vld [vmem:[#allocation9 + $0x3a8] sm:$0xff]  ;;  %v465_v30 = vld [vmem:[#allocation9 + $0x1a0] sm:$0xff] }
  0x90   :  { %555 = vmatprep.subr.mxu0 %v430_v32  ;;  %632 = vmatprep.subr.mxu1 %v494_v33  ;;  %v529_v31 = vld [vmem:[#allocation9 + $0x3a0] sm:$0xff]  ;;  %v464_v32 = vld [vmem:[#allocation9 + $0x198] sm:$0xff] }
  0x91   :  { %556 = vmatpush1.msra.mxu0 %v429_v34  ;;  %633 = vmatpush1.msra.mxu1 %v493_v35  ;;  %v528_v33 = vld [vmem:[#allocation9 + $0x398] sm:$0xff]  ;;  %v463_v34 = vld [vmem:[#allocation9 + $0x190] sm:$0xff] }
  0x92   :  { %557 = vmatprep.subr.mxu0 %v428_v36  ;;  %634 = vmatprep.subr.mxu1 %v492_v37  ;;  %v527_v35 = vld [vmem:[#allocation9 + $0x390] sm:$0xff]  ;;  %v462_v36 = vld [vmem:[#allocation9 + $0x188] sm:$0xff] }
  0x93   :  { %558 = vmatpush1.msra.mxu0 %v427_v38  ;;  %635 = vmatpush1.msra.mxu1 %v491_v39  ;;  %v526_v37 = vld [vmem:[#allocation9 + $0x388] sm:$0xff]  ;;  %v461_v38 = vld [vmem:[#allocation9 + $0x180] sm:$0xff] }
  0x94   :  { %559 = vmatprep.subr.mxu0 %v426_v40  ;;  %636 = vmatprep.subr.mxu1 %v490_v41  ;;  %v525_v39 = vld [vmem:[#allocation9 + $0x380] sm:$0xff]  ;;  %v460_v40 = vld [vmem:[#allocation9 + $0x178] sm:$0xff] }
  0x95   :  { %560 = vmatpush1.msra.mxu0 %v425_v42  ;;  %637 = vmatpush1.msra.mxu1 %v489_v43  ;;  %v524_v41 = vld [vmem:[#allocation9 + $0x378] sm:$0xff]  ;;  %v459_v42 = vld [vmem:[#allocation9 + $0x170] sm:$0xff] }
  0x96   :  { %561 = vmatprep.subr.mxu0 %v424_v44  ;;  %638 = vmatprep.subr.mxu1 %v488_v45  ;;  %v523_v43 = vld [vmem:[#allocation9 + $0x370] sm:$0xff]  ;;  %v458_v44 = vld [vmem:[#allocation9 + $0x168] sm:$0xff] }
  0x97   :  { %562 = vmatpush1.msra.mxu0 %v423_v46  ;;  %639 = vmatpush1.msra.mxu1 %v487_v47  ;;  %v522_v45 = vld [vmem:[#allocation9 + $0x368] sm:$0xff]  ;;  %v457_v46 = vld [vmem:[#allocation9 + $0x160] sm:$0xff] }
  0x98   :  { %563 = vmatprep.subr.mxu0 %v422_v48  ;;  %640 = vmatprep.subr.mxu1 %v486_v49  ;;  %v521_v47 = vld [vmem:[#allocation9 + $0x360] sm:$0xff]  ;;  %v456_v48 = vld [vmem:[#allocation9 + $0x158] sm:$0xff] }
  0x99   :  { %564 = vmatpush1.msra.mxu0 %v421_v50  ;;  %641 = vmatpush1.msra.mxu1 %v485_v51  ;;  %v520_v49 = vld [vmem:[#allocation9 + $0x358] sm:$0xff]  ;;  %v455_v50 = vld [vmem:[#allocation9 + $0x150] sm:$0xff] }
  0x9a   :  { %565 = vmatprep.subr.mxu0 %v420_v52  ;;  %642 = vmatprep.subr.mxu1 %v484_v53  ;;  %v519_v51 = vld [vmem:[#allocation9 + $0x350] sm:$0xff]  ;;  %v454_v52 = vld [vmem:[#allocation9 + $0x148] sm:$0xff] }
  0x9b   :  { %566 = vmatpush1.msra.mxu0 %v419_v54  ;;  %643 = vmatpush1.msra.mxu1 %v483_v55  ;;  %v518_v53 = vld [vmem:[#allocation9 + $0x348] sm:$0xff]  ;;  %v453_v54 = vld [vmem:[#allocation9 + $0x140] sm:$0xff] }
  0x9c   :  { %567 = vmatprep.subr.mxu0 %v418_v56  ;;  %644 = vmatprep.subr.mxu1 %v482_v57  ;;  %v517_v55 = vld [vmem:[#allocation9 + $0x340] sm:$0xff]  ;;  %v452_v56 = vld [vmem:[#allocation9 + $0x138] sm:$0xff] }
  0x9d   :  { %568 = vmatpush1.msra.mxu0 %v417_v58  ;;  %645 = vmatpush1.msra.mxu1 %v481_v59  ;;  %v516_v57 = vld [vmem:[#allocation9 + $0x338] sm:$0xff]  ;;  %v451_v58 = vld [vmem:[#allocation9 + $0x130] sm:$0xff] }
  0x9e   :  { %569 = vmatprep.subr.mxu0 %v416_v60  ;;  %646 = vmatprep.subr.mxu1 %v480_v61  ;;  %v515_v59 = vld [vmem:[#allocation9 + $0x330] sm:$0xff]  ;;  %v450_v60 = vld [vmem:[#allocation9 + $0x128] sm:$0xff] }
  0x9f   :  { %570 = vmatpush1.msra.mxu0 %v415_v62  ;;  %647 = vmatpush1.msra.mxu1 %v479_v0  ;;  %v514_v61 = vld [vmem:[#allocation9 + $0x328] sm:$0xff]  ;;  %v449_v62 = vld [vmem:[#allocation9 + $0x120] sm:$0xff] }
  0xa0   :  { %571 = vmatprep.subr.mxu0 %v414_v3  ;;  %648 = vmatprep.subr.mxu1 %v478_v4  ;;  %v513_v0 = vld [vmem:[#allocation9 + $0x320] sm:$0xff]  ;;  %v448_v3 = vld [vmem:[#allocation9 + $0x118] sm:$0xff] }
  0xa1   :  { %572 = vmatpush1.msra.mxu0 %v413_v5  ;;  %649 = vmatpush1.msra.mxu1 %v477_v6  ;;  %v512_v4 = vld [vmem:[#allocation9 + $0x318] sm:$0xff]  ;;  %v447_v5 = vld [vmem:[#allocation9 + $0x110] sm:$0xff] }
  0xa2   :  { %573 = vmatprep.subr.mxu0 %v476_v8  ;;  %650 = vmatprep.subr.mxu1 %v540_v9  ;;  %v511_v6 = vld [vmem:[#allocation9 + $0x310] sm:$0xff]  ;;  %v446_v8 = vld [vmem:[#allocation9 + $0x108] sm:$0xff] }
  0xa3   :  { %574 = vmatpush2.msra.mxu0 %v475_v10  ;;  %651 = vmatpush2.msra.mxu1 %v539_v11  ;;  %v510_v9 = vld [vmem:[#allocation9 + $0x308] sm:$0xff]  ;;  %v445_v10 = vld [vmem:[#allocation9 + $0x100] sm:$0xff] }
  0xa4   :  { %575 = vmatprep.subr.mxu0 %v474_v12  ;;  %652 = vmatprep.subr.mxu1 %v538_v13  ;;  %v509_v11 = vld [vmem:[#allocation9 + $0x300] sm:$0xff]  ;;  %v227_v12 = vlaneseq }
  0xa5   :  { %576 = vmatpush2.msra.mxu0 %v473_v14  ;;  %653 = vmatpush2.msra.mxu1 %v537_v15 }
  0xa6   :  { %577 = vmatprep.subr.mxu0 %v472_v16  ;;  %654 = vmatprep.subr.mxu1 %v536_v17  ;;  %v228_v13 = vshrl.u32 %v227_v12, 7  ;;  %v225_v16 = vld [vmem:[#allocation8] sm:$0xf] }
  0xa7   :  { %578 = vmatpush2.msra.mxu0 %v471_v18  ;;  %655 = vmatpush2.msra.mxu1 %v535_v19 }
  0xa8   :  { %579 = vmatprep.subr.mxu0 %v470_v20  ;;  %656 = vmatprep.subr.mxu1 %v534_v21  ;;  %v1043_v14 = vsub.s32 0, %v228_v13  ;;  %v237_v15 = vsub.s32 2, %v228_v13  ;;  %v1045_v17 = vsub.s32 1, %v228_v13  ;;  %v241_v18 = vsub.s32 3, %v228_v13 }
  0xa9   :  { %580 = vmatpush2.msra.mxu0 %v469_v22  ;;  %657 = vmatpush2.msra.mxu1 %v533_v23 }
  0xaa   :  { %581 = vmatprep.subr.mxu0 %v468_v24  ;;  %658 = vmatprep.subr.mxu1 %v532_v25  ;;  %v230_v19 = vrot.slane %v225_v16, %v1043_v14  ;;  %v238_v20 = vrot.slane %v225_v16, %v237_v15  ;;  %v234_v21 = vrot.slane %v225_v16, %v1045_v17 }
  0xab   :  { %582 = vmatpush2.msra.mxu0 %v467_v26  ;;  %659 = vmatpush2.msra.mxu1 %v531_v27  ;;  %v242_v22 = vrot.slane %v225_v16, %v241_v18 }
  0xac   :  { %583 = vmatprep.subr.mxu0 %v466_v28  ;;  %660 = vmatprep.subr.mxu1 %v530_v29 }
  0xad   :  { %584 = vmatpush2.msra.mxu0 %v465_v30  ;;  %661 = vmatpush2.msra.mxu1 %v529_v31 }
  0xae   :  { %585 = vmatprep.subr.mxu0 %v464_v32  ;;  %662 = vmatprep.subr.mxu1 %v528_v33 }
  0xaf   :  { %586 = vmatpush2.msra.mxu0 %v463_v34  ;;  %663 = vmatpush2.msra.mxu1 %v527_v35 }
  0xb0   :  { %587 = vmatprep.subr.mxu0 %v462_v36  ;;  %664 = vmatprep.subr.mxu1 %v526_v37 }
  0xb1   :  { %588 = vmatpush2.msra.mxu0 %v461_v38  ;;  %665 = vmatpush2.msra.mxu1 %v525_v39 }
  0xb2   :  { %589 = vmatprep.subr.mxu0 %v460_v40  ;;  %666 = vmatprep.subr.mxu1 %v524_v41 }
  0xb3   :  { %590 = vmatpush2.msra.mxu0 %v459_v42  ;;  %667 = vmatpush2.msra.mxu1 %v523_v43 }
  0xb4   :  { %591 = vmatprep.subr.mxu0 %v458_v44  ;;  %668 = vmatprep.subr.mxu1 %v522_v45 }
  0xb5   :  { %592 = vmatpush2.msra.mxu0 %v457_v46  ;;  %669 = vmatpush2.msra.mxu1 %v521_v47  ;;  %v706_v47 = vld [vmem:[#allocation11] ss:$4 sm:$0x3] }
  0xb6   :  { %593 = vmatprep.subr.mxu0 %v456_v48  ;;  %670 = vmatprep.subr.mxu1 %v520_v49 }
  0xb7   :  { %594 = vmatpush2.msra.mxu0 %v455_v50  ;;  %671 = vmatpush2.msra.mxu1 %v519_v51  ;;  %v723_v51 = vrot.slane %v706_v47, %v1043_v14 }
  0xb8   :  { %595 = vmatprep.subr.mxu0 %v454_v52  ;;  %672 = vmatprep.subr.mxu1 %v518_v53 }
  0xb9   :  { %596 = vmatpush2.msra.mxu0 %v453_v54  ;;  %673 = vmatpush2.msra.mxu1 %v517_v55 }
  0xba   :  { %597 = vmatprep.subr.mxu0 %v452_v56  ;;  %674 = vmatprep.subr.mxu1 %v516_v57  ;;  %v727_v56 = vrot.slane %v706_v47, %v1045_v17 }
  0xbb   :  { %598 = vmatpush2.msra.mxu0 %v451_v58  ;;  %675 = vmatpush2.msra.mxu1 %v515_v59 }
  0xbc   :  { %599 = vmatprep.subr.mxu0 %v450_v60  ;;  %676 = vmatprep.subr.mxu1 %v514_v61 }
  0xbd   :  { %600 = vmatpush2.msra.mxu0 %v449_v62  ;;  %677 = vmatpush2.msra.mxu1 %v513_v0 }
  0xbe   :  { %601 = vmatprep.subr.mxu0 %v448_v3  ;;  %678 = vmatprep.subr.mxu1 %v512_v4 }
  0xbf   :  { %602 = vmatpush2.msra.mxu0 %v447_v5  ;;  %679 = vmatpush2.msra.mxu1 %v511_v6 }
  0xc0   :  { %603 = vmatprep.subr.mxu0 %v446_v8  ;;  %680 = vmatprep.subr.mxu1 %v510_v9 }
  0xc1   :  { %604 = vmatpush2.msra.mxu0 %v445_v10  ;;  %681 = vmatpush2.msra.mxu1 %v509_v11 }
 0x13f   :  { %v313_v23 = vpop.f32.mrf.mxu0  ;;  %v390_v24 = vpop.f32.mrf.mxu1 }
 0x140   :  { %v314_v25 = vadd.f32 %v313_v23, %v230_v19  ;;  %v391_v26 = vadd.f32 %v390_v24, %v238_v20 }
 0x141   :  { %v315_v27 = vpop.f32.mrf.mxu0  ;;  %v392_v28 = vpop.f32.mrf.mxu1 }
 0x142   :  { %v316_v29 = vadd.f32 %v315_v27, %v234_v21  ;;  %v393_v30 = vadd.f32 %v392_v28, %v242_v22  ;;  %v401_v35 = vmax.f32 %v314_v25, 0.0  ;;  %v403_v36 = vmax.f32 %v391_v26, 0.0 }
 0x143   :  { %v319_v31 = vpop.f32.mrf.mxu0  ;;  %v396_v32 = vpop.f32.mrf.mxu1 }
 0x144   :  { %v402_v33 = vmax.f32 %v316_v29, 0.0  ;;  %v404_v34 = vmax.f32 %v393_v30, 0.0  ;;  %v320_v37 = vadd.f32 %v319_v31, %v230_v19  ;;  %v397_v38 = vadd.f32 %v396_v32, %v238_v20  ;;  %v708_v30 = vld [vmem:[#allocation11 + $0x1] ss:$4 sm:$0x3] }
 0x145   :  { %v321_v39 = vpop.f32.mrf.mxu0  ;;  %v398_v40 = vpop.f32.mrf.mxu1  ;;  %v710_v31 = vld [vmem:[#allocation11 + $0x2] ss:$4 sm:$0x3] }
 0x146   :  { %v322_v41 = vadd.f32 %v321_v39, %v234_v21  ;;  %v399_v42 = vadd.f32 %v398_v40, %v242_v22  ;;  %605 = vmatprep.mubr.f32.mxu0 %v402_v33  ;;  %682 = vmatprep.mubr.f32.mxu1 %v404_v34  ;;  %v405_v45 = vmax.f32 %v320_v37, 0.0  ;;  %v407_v46 = vmax.f32 %v397_v38, 0.0 }
 0x147   :  { %606 = vmatmul.mubr.f32.vlgmr.msra.gmra.mxu0 %v401_v35  ;;  %683 = vmatmul.mubr.f32.vlgmr.msra.gmra.mxu1 %v403_v36  ;;  %v775_v34 = vrot.slane %v708_v30, %v1043_v14  ;;  %v779_v35 = vrot.slane %v708_v30, %v1045_v17  ;;  %v790_v39 = vrot.slane %v710_v31, %v1043_v14 }
 0x148   :  { %v406_v43 = vmax.f32 %v322_v41, 0.0  ;;  %v408_v44 = vmax.f32 %v399_v42, 0.0  ;;  %v794_v40 = vrot.slane %v710_v31, %v1045_v17 }
 0x14a   :  { %611 = vmatprep.mubr.f32.mxu0 %v406_v43  ;;  %688 = vmatprep.mubr.f32.mxu1 %v408_v44 }
 0x14b   :  { %612 = vmatmul.mubr.f32.gmra.mxu0 %v405_v45  ;;  %689 = vmatmul.mubr.f32.gmra.mxu1 %v407_v46 }
 0x207   :  { %v607_v48 = vpop.f32.mrf.mxu0  ;;  %v684_v49 = vpop.f32.mrf.mxu1 }
 0x208   :  { %v685_v50 = vadd.f32 %v684_v49, %v607_v48 }
 0x209   :  { %v609_v52 = vpop.f32.mrf.mxu0  ;;  %v686_v53 = vpop.f32.mrf.mxu1 }
 0x20a   :  { %v715_v54 = vadd.f32 %v685_v50, %v1029_v1  ;;  %v687_v55 = vadd.f32 %v686_v53, %v609_v52 }
 0x20b   :  { %v613_v57 = vpop.f32.mrf.mxu0  ;;  %v690_v58 = vpop.f32.mrf.mxu1 }
 0x20c   :  { %v716_v59 = vadd.f32 %v687_v55, %v1027_v63  ;;  %v691_v60 = vadd.f32 %v690_v58, %v613_v57  ;;  %v730_v61 = vadd.f32 %v723_v51, %v715_v54 }
 0x20d   :  { %v615_v62 = vpop.f32.mrf.mxu0  ;;  %v692_v0 = vpop.f32.mrf.mxu1 }
 0x20e   :  { %v717_v3 = vadd.f32 %v691_v60, %v1039_v7  ;;  %v693_v4 = vadd.f32 %v692_v0, %v615_v62  ;;  %v731_v5 = vadd.f32 %v727_v56, %v716_v59  ;;  %v743_v6 = vmul.f32 %v730_v61, %v730_v61 }
 0x210   :  { %v732_v8 = vadd.f32 %v723_v51, %v717_v3  ;;  %v718_v9 = vadd.f32 %v693_v4, %v1032_v2  ;;  %v734_v1 = vadd.f32 %v731_v5, %v730_v61  ;;  %v744_v10 = vmul.f32 %v731_v5, %v731_v5 }
 0x212   :  { %v733_v11 = vadd.f32 %v727_v56, %v718_v9  ;;  %735 = vadd.xlane.f32.xlu0 %v734_v1  ;;  %v747_v12 = vadd.f32 %v744_v10, %v743_v6  ;;  %v745_v63 = vmul.f32 %v732_v8, %v732_v8 }
 0x214   :  { %748 = vadd.xlane.f32.xlu1 %v747_v12  ;;  %v737_v13 = vadd.f32 %v733_v11, %v732_v8  ;;  %v746_v15 = vmul.f32 %v733_v11, %v733_v11 }
 0x216   :  { %738 = vadd.xlane.f32.xlu0 %v737_v13  ;;  %v750_v16 = vadd.f32 %v746_v15, %v745_v63 }
 0x218   :  { %751 = vadd.xlane.f32.xlu1 %v750_v16 }
 0x29b   :  { %v736_v18 = vpop.xlane.xlu0 %735 }
 0x29c   :  { %v741_v7 = vmul.f32 0.00390625, %v736_v18 }
 0x29d   :  { %v749_v19 = vpop.xlane.xlu1 %748 }
 0x29e   :  { %v753_v20 = vmul.f32 0.00390625, %v749_v19  ;;  %v755_v21 = vmul.f32 %v741_v7, %v741_v7  ;;  %v763_v32 = vsub.f32 %v730_v61, %v741_v7  ;;  %v764_v33 = vsub.f32 %v731_v5, %v741_v7 }
 0x29f   :  { %v739_v22 = vpop.xlane.xlu0 %738 }
 0x2a0   :  { %v757_v23 = vsub.f32 %v753_v20, %v755_v21  ;;  %v742_v2 = vmul.f32 0.00390625, %v739_v22 }
 0x2a1   :  { %v752_v24 = vpop.xlane.xlu1 %751 }
 0x2a2   :  { %v759_v25 = vadd.f32 1e-05, %v757_v23  ;;  %v754_v26 = vmul.f32 0.00390625, %v752_v24  ;;  %v756_v27 = vmul.f32 %v742_v2, %v742_v2  ;;  %v765_v43 = vsub.f32 %v732_v8, %v742_v2 }
 0x2a3   :  { %v766_v44 = vsub.f32 %v733_v11, %v742_v2 }
 0x2a4   :  { %834 = vrsqrt.f32 %v759_v25  ;;  %v758_v28 = vsub.f32 %v754_v26, %v756_v27 }
 0x2a6   :  { %v760_v29 = vadd.f32 1e-05, %v758_v28 }
 0x2a8   :  { %836 = vrsqrt.f32 %v760_v29 }
 0x2b1   :  { %v835_v36 = vpop.eup %834 }
 0x2b2   :  { %v767_v37 = vmul.f32 %v835_v36, %v763_v32  ;;  %v768_v38 = vmul.f32 %v835_v36, %v764_v33 }
 0x2b4   :  { %v782_v41 = vmul.f32 %v775_v34, %v767_v37  ;;  %v783_v42 = vmul.f32 %v779_v35, %v768_v38 }
 0x2b5   :  { %v837_v45 = vpop.eup %836 }
 0x2b6   :  { %v797_v46 = vadd.f32 %v790_v39, %v782_v41  ;;  %v798_v47 = vadd.f32 %v794_v40, %v783_v42  ;;  %v769_v48 = vmul.f32 %v837_v45, %v765_v43  ;;  %v770_v49 = vmul.f32 %v837_v45, %v766_v44 }
 0x2b8   :  { %801 = vst [vmem:[#allocation12] sm:$0xff] %v797_v46  ;;  %802 = vst [vmem:[#allocation12 + $0x8] sm:$0xff] %v798_v47  ;;  %v784_v50 = vmul.f32 %v775_v34, %v769_v48  ;;  %v785_v51 = vmul.f32 %v779_v35, %v770_v49 }
 0x2ba   :  { %v799_v52 = vadd.f32 %v790_v39, %v784_v50  ;;  %v800_v53 = vadd.f32 %v794_v40, %v785_v51 }
 0x2bc   :  { %803 = vst [vmem:[#allocation12 + $0x10] sm:$0xff] %v799_v52  ;;  %804 = vst [vmem:[#allocation12 + $0x18] sm:$0xff] %v800_v53 }
 0x2bd   :  { %949 = shalt.err (!%p946_p1)
}
 0x2be   :  { %816 = dma.vmem_to_hbm [thread:$0]  %s811_s4, 512, %s1070_s5, [#allocation5], %s971_s30, %s971_s30, %s972_s6  }
 0x2bf   :  { %964 = dma.done.wait [#allocation5], 512  }
 0x2c0   :  { %965 = vsyncadd [#allocation5], 4294966784 }
 0x2c1   :  { %820 = vsyncpa [#allocation4], 1 }
 0x2c2   :  { %821 = vsyncpa [#allocation7], 1 }
 0x2c3   :  { %822 = vsyncpa [#allocation10], 1 }
 0x2c4   :  { %823 = vsyncpa [#allocation5], 1 }

</bundles_post_ra>
